<compile_context>
chip_gen: v6e
topology: v6e:2x2x1
jax: 0.10.0
libtpu: 0.0.40
codegen_flags: <defaults>
</compile_context>

<pallas_src>
import functools

import jax
import jax.numpy as jnp
from jax import lax
from jax.experimental import pallas as pl
from jax.experimental.pallas import tpu as pltpu

LRELU_SLOPE = 0.2
TM_MAX = 8192                      # im2col rows per grid step (multiple of 16)
VMEM_LIMIT = 32 * 1024 * 1024      # safe on v5e/v6e (128 MiB) and v7x (64 MiB)


def _round_up(x, m):
    return ((x + m - 1) // m) * m


# ----------------------------- Pallas kernels ------------------------------

def _conv_lrelu_kernel(p_ref, w_ref, b_ref, o_ref, *, slope):
    # conv-as-matmul (bf16 x bf16 -> f32 accumulate) + bias + LeakyReLU, one M tile
    acc = jnp.dot(p_ref[...], w_ref[...], preferred_element_type=jnp.float32)
    acc = acc + b_ref[...]
    acc = jnp.where(acc >= 0.0, acc, slope * acc)
    o_ref[...] = acc.astype(o_ref.dtype)


def _conv_mse_kernel(p_ref, w_ref, b_ref, o_ref, sq_ref, *, tm, valid_rows,
                     real_rows, inv_n):
    # final conv layer fused with MSELoss against the per-row real/fake label.
    # diff^2 is accumulated elementwise into a VMEM scratch across M tiles; the
    # cross-lane reduction, scaling and (1,1) store happen only in finalize.
    i = pl.program_id(0)

    @pl.when(i == 0)
    def _init():
        sq_ref[...] = jnp.zeros_like(sq_ref)
        o_ref[...] = jnp.zeros_like(o_ref)

    pred = jnp.dot(p_ref[...], w_ref[...], preferred_element_type=jnp.float32)
    pred = pred + b_ref[...]                                   # (tm, 1) f32

    row = i * tm + lax.broadcasted_iota(jnp.int32, pred.shape, 0)
    target = jnp.where(row < real_rows, 1.0, 0.0)              # real label first half
    # NaN-safe mask of ragged/OOB rows (their input values are unspecified).
    diff = jnp.where(row < valid_rows, pred - target, 0.0)
    sq_ref[...] += diff * diff

    @pl.when(i == pl.num_programs(0) - 1)
    def _finalize():
        total = jnp.sum(sq_ref[...]) * inv_n
        o_ref[...] = total[None, None]


# ----------------------------- kernel wrappers ------------------------------

def conv_lrelu(patches, w_mat, b_row, slope=LRELU_SLOPE, tm_max=TM_MAX):
    """(M, K) bf16 im2col patches x (K, Cout) bf16 weights -> (M, Cout) bf16."""
    M, K = patches.shape
    Cout = w_mat.shape[1]
    tm = min(tm_max, _round_up(M, 16))
    return pl.pallas_call(
        functools.partial(_conv_lrelu_kernel, slope=slope),
        grid=(pl.cdiv(M, tm),),
        out_shape=jax.ShapeDtypeStruct((M, Cout), jnp.bfloat16),
        in_specs=[
            pl.BlockSpec((tm, K), lambda i: (i, 0)),
            pl.BlockSpec((K, Cout), lambda i: (0, 0)),
            pl.BlockSpec((1, Cout), lambda i: (0, 0)),
        ],
        out_specs=pl.BlockSpec((tm, Cout), lambda i: (i, 0)),
        compiler_params=pltpu.CompilerParams(
            dimension_semantics=("parallel",),
            vmem_limit_bytes=VMEM_LIMIT),
    )(patches, w_mat, b_row)


def conv_mse(patches, w_mat, b_row, real_rows, inv_n, tm_max=TM_MAX):
    """Final conv (Cout=1) fused with MSE against per-row labels -> scalar."""
    M, K = patches.shape
    Cout = w_mat.shape[1]
    tm = min(tm_max, _round_up(M, 16))
    kernel = functools.partial(_conv_mse_kernel, tm=tm, valid_rows=M,
                               real_rows=real_rows, inv_n=float(inv_n))
    out = pl.pallas_call(
        kernel,
        grid=(pl.cdiv(M, tm),),
        out_shape=jax.ShapeDtypeStruct((1, 1), jnp.float32),
        in_specs=[
            pl.BlockSpec((tm, K), lambda i: (i, 0)),
            pl.BlockSpec((K, Cout), lambda i: (0, 0)),
            pl.BlockSpec((1, Cout), lambda i: (0, 0)),
        ],
        out_specs=pl.BlockSpec((1, 1), lambda i: (0, 0)),
        scratch_shapes=[pltpu.VMEM((tm, 1), jnp.float32)],
        compiler_params=pltpu.CompilerParams(
            dimension_semantics=("arbitrary",),   # reduction over M tiles
            vmem_limit_bytes=VMEM_LIMIT),
    )(patches, w_mat, b_row)
    return out[0, 0]


# ------------------------------- glue (JAX) --------------------------------

def im2col_nhwc(x, kh, kw, stride, pad):
    """NHWC -> (B*Ho*Wo, kh*kw*C) patches, row-major over (ki, kj, c_in)."""
    B, H, W, C = x.shape
    xp = jnp.pad(x, ((0, 0), (pad, pad), (pad, pad), (0, 0)))
    Ho = (H + 2 * pad - kh) // stride + 1
    Wo = (W + 2 * pad - kw) // stride + 1
    cols = []
    for i in range(kh):
        for j in range(kw):
            cols.append(xp[:, i:i + stride * Ho:stride,
                           j:j + stride * Wo:stride, :])      # (B, Ho, Wo, C)
    patches = jnp.concatenate(cols, axis=-1)                  # (B, Ho, Wo, kh*kw*C)
    return patches.reshape(B * Ho * Wo, kh * kw * C), B, Ho, Wo


def w_to_mat(w):
    """PyTorch conv weight (Cout, Cin, kh, kw) -> (kh*kw*Cin, Cout)."""
    Cout, Cin, kh, kw = w.shape
    return w.transpose(2, 3, 1, 0).reshape(kh * kw * Cin, Cout)


def d_spectral_mse_batched(x_nhwc, params, num_real):
    """PanGan-style spectral discriminator (3 convs) on a batched real+fake stack,
    fused with MSE against the per-sample real/fake label. Returns the SUM of the
    real-half mean MSE and the fake-half mean MSE (equal-size halves)."""
    (w1, b1), (w2, b2), (w3, b3) = params
    # Cast once, BEFORE the 9x im2col expansion; layers 2/3 are already bf16.
    x = x_nhwc.astype(jnp.bfloat16)
    wm1 = w_to_mat(w1).astype(jnp.bfloat16)
    wm2 = w_to_mat(w2).astype(jnp.bfloat16)
    wm3 = w_to_mat(w3).astype(jnp.bfloat16)
    br1 = b1.reshape(1, -1).astype(jnp.float32)
    br2 = b2.reshape(1, -1).astype(jnp.float32)
    br3 = b3.reshape(1, -1).astype(jnp.float32)

    # conv1: 3x3 stride 2, LeakyReLU
    p, Bp, Ho, Wo = im2col_nhwc(x, 3, 3, 2, 1)
    h = conv_lrelu(p, wm1, br1).reshape(Bp, Ho, Wo, -1)        # stay NHWC, bf16
    # conv2: 3x3 stride 2, LeakyReLU
    p, Bp, Ho, Wo = im2col_nhwc(h, 3, 3, 2, 1)
    h = conv_lrelu(p, wm2, br2).reshape(Bp, Ho, Wo, -1)
    # conv3: 3x3 stride 1 -> 1 channel, fused with MSE(pred, label)
    p, Bp, Ho, Wo = im2col_nhwc(h, 3, 3, 1, 1)
    real_rows = num_real * Ho * Wo                 # first half of batch is "real"
    inv_n = 1.0 / float(num_real * Ho * Wo)        # per-half mean (equal halves)
    return conv_mse(p, wm3, br3, real_rows=real_rows, inv_n=inv_n)


def pangan_adv_discrim_spectral_loss(y_ms, y_pan, x_net, params, weight_adv=1.0):
    """Forward of PanganAdvDiscrimSpectralLoss.

    y_ms : (B, C, H/f, W/f) low-res multispectral measurement
    y_pan: (B, 1, H, W)     panchromatic measurement
    x_net: (B, C, H, W)     network HRMS estimate
    """
    B, C, Hl, Wl = y_ms.shape
    H, W = y_pan.shape[2], y_pan.shape[3]
    f = H // Hl
    # Pansharpen.A_adjoint followed by hrms_from_volume (approximated, see TODO).
    up = jnp.repeat(jnp.repeat(y_ms, f, axis=2), f, axis=3) / float(f * f)
    pan = jnp.broadcast_to(y_pan, (B, C, H, W)) / float(C)
    hrms_adjoint = up + pan
    hrms_pred = jax.lax.stop_gradient(x_net)                   # .detach()

    # Batch real + fake into a single discriminator pass; convert to NHWC once.
    x = jnp.concatenate([hrms_adjoint, hrms_pred], axis=0)     # (2B, C, H, W)
    x_nhwc = jnp.transpose(x, (0, 2, 3, 1))                    # (2B, H, W, C)
    loss = d_spectral_mse_batched(x_nhwc, params, num_real=B)
    return loss * weight_adv


# ------------------------------ parameter init ------------------------------

def init_discriminator_params(key, c_in):
    ks = jax.random.split(key, 6)
    w1 = 0.1 * jax.random.normal(ks[0], (16, c_in, 3, 3), jnp.float32)
    b1 = 0.01 * jax.random.normal(ks[1], (16,), jnp.float32)
    w2 = 0.1 * jax.random.normal(ks[2], (32, 16, 3, 3), jnp.float32)
    b2 = 0.01 * jax.random.normal(ks[3], (32,), jnp.float32)
    w3 = 0.1 * jax.random.normal(ks[4], (1, 32, 3, 3), jnp.float32)
    b3 = 0.01 * jax.random.normal(ks[5], (1,), jnp.float32)
    return ((w1, b1), (w2, b2), (w3, b3))


if __name__ == "__main__":
    key = jax.random.PRNGKey(0)
    k_ms, k_pan, k_x, k_d = jax.random.split(key, 4)

    B, C, H, W, f = 2, 4, 16, 16, 4
    y_ms = jax.random.normal(k_ms, (B, C, H // f, W // f), jnp.float32)
    y_pan = jax.random.normal(k_pan, (B, 1, H, W), jnp.float32)
    x_net = jax.random.normal(k_x, (B, C, H, W), jnp.float32)
    params = init_discriminator_params(k_d, C)

    loss_fn = jax.jit(functools.partial(pangan_adv_discrim_spectral_loss,
                                        weight_adv=1.0))
    loss = jax.block_until_ready(loss_fn(y_ms, y_pan, x_net, params))
    assert jnp.isfinite(loss)
    print("KERNEL_OK")
</pallas_src>

<mosaic_0001>
module attributes {stable_mosaic.version = 11 : i64} {
  func.func @_conv_lrelu_kernel(%arg0: i32, %arg1: memref<256x36xbf16, #tpu.memory_space<vmem>>, %arg2: memref<36x16xbf16, #tpu.memory_space<vmem>>, %arg3: memref<1x16xf32, #tpu.memory_space<vmem>>, %arg4: memref<256x16xbf16, #tpu.memory_space<vmem>>) attributes {dimension_semantics = [#tpu.dimension_semantics<parallel>], iteration_bounds = array<i64: 1>, scalar_prefetch = 0 : i64, scratch_operands = 0 : i64, tpu.core_type = #tpu.core_type<tc>, window_params = [{transform_indices = @transform_0, window_bounds = array<i64: 256, 36>}, {pipeline_mode = #tpu.pipeline_mode<synchronous>, transform_indices = @transform_1, window_bounds = array<i64: 36, 16>}, {pipeline_mode = #tpu.pipeline_mode<synchronous>, transform_indices = @transform_2, window_bounds = array<i64: 1, 16>}, {transform_indices = @transform_3, window_bounds = array<i64: 256, 16>}]} {
    %c0 = arith.constant 0 : index
    %c0_0 = arith.constant 0 : index
    %0 = vector.load %arg1[%c0, %c0_0] : memref<256x36xbf16, #tpu.memory_space<vmem>>, vector<256x36xbf16>
    %c0_1 = arith.constant 0 : index
    %c0_2 = arith.constant 0 : index
    %1 = vector.load %arg2[%c0_1, %c0_2] : memref<36x16xbf16, #tpu.memory_space<vmem>>, vector<36x16xbf16>
    %cst = arith.constant dense<0.000000e+00> : vector<256x16xf32>
    %2 = tpu.matmul %0, %1, %cst {dimension_numbers = #tpu.dot_dimension_numbers<[1], [0], [0], [1], [0, 0, 1, 1], [], []>} : vector<256x36xbf16>, vector<36x16xbf16>, vector<256x16xf32> -> vector<256x16xf32>
    %c0_3 = arith.constant 0 : index
    %c0_4 = arith.constant 0 : index
    %3 = vector.load %arg3[%c0_3, %c0_4] : memref<1x16xf32, #tpu.memory_space<vmem>>, vector<1x16xf32>
    %4 = vector.broadcast %3 : vector<1x16xf32> to vector<256x16xf32>
    %5 = arith.addf %2, %4 : vector<256x16xf32>
    %cst_5 = arith.constant 0.000000e+00 : f32
    %6 = vector.broadcast %cst_5 : f32 to vector<256x16xf32>
    %7 = arith.cmpf oge, %5, %6 : vector<256x16xf32>
    %cst_6 = arith.constant 2.000000e-01 : f32
    %8 = vector.broadcast %cst_6 : f32 to vector<256x16xf32>
    %9 = arith.mulf %8, %5 : vector<256x16xf32>
    %10 = arith.select %7, %5, %9 : vector<256x16xi1>, vector<256x16xf32>
    %11 = arith.truncf %10 : vector<256x16xf32> to vector<256x16xbf16>
    %c0_7 = arith.constant 0 : index
    %c0_8 = arith.constant 0 : index
    %12 = vector.load %arg4[%c0_7, %c0_8] : memref<256x16xbf16, #tpu.memory_space<vmem>>, vector<256x16xbf16>
    tpu.vector_store %arg4[%c0_7, %c0_8], %11 {strides = array<i32>} : memref<256x16xbf16, #tpu.memory_space<vmem>>, vector<256x16xbf16>,
    return
  }
  func.func @transform_0(%arg0: i32) -> (i32, i32) {
    %c0_i32 = arith.constant 0 : i32
    %c0_i32_0 = arith.constant 0 : i32
    return %arg0, %c0_i32 : i32, i32
  }
  func.func @transform_1(%arg0: i32) -> (i32, i32) {
    %c0_i32 = arith.constant 0 : i32
    %c0_i32_0 = arith.constant 0 : i32
    %c0_i32_1 = arith.constant 0 : i32
    return %c0_i32, %c0_i32_0 : i32, i32
  }
  func.func @transform_2(%arg0: i32) -> (i32, i32) {
    %c0_i32 = arith.constant 0 : i32
    %c0_i32_0 = arith.constant 0 : i32
    %c0_i32_1 = arith.constant 0 : i32
    return %c0_i32, %c0_i32_0 : i32, i32
  }
  func.func @transform_3(%arg0: i32) -> (i32, i32) {
    %c0_i32 = arith.constant 0 : i32
    %c0_i32_0 = arith.constant 0 : i32
    return %arg0, %c0_i32 : i32, i32
  }
}

module attributes {stable_mosaic.version = 11 : i64} {
  func.func @_conv_lrelu_kernel(%arg0: i32, %arg1: memref<64x144xbf16, #tpu.memory_space<vmem>>, %arg2: memref<144x32xbf16, #tpu.memory_space<vmem>>, %arg3: memref<1x32xf32, #tpu.memory_space<vmem>>, %arg4: memref<64x32xbf16, #tpu.memory_space<vmem>>) attributes {dimension_semantics = [#tpu.dimension_semantics<parallel>], iteration_bounds = array<i64: 1>, scalar_prefetch = 0 : i64, scratch_operands = 0 : i64, tpu.core_type = #tpu.core_type<tc>, window_params = [{transform_indices = @transform_0, window_bounds = array<i64: 64, 144>}, {pipeline_mode = #tpu.pipeline_mode<synchronous>, transform_indices = @transform_1, window_bounds = array<i64: 144, 32>}, {pipeline_mode = #tpu.pipeline_mode<synchronous>, transform_indices = @transform_2, window_bounds = array<i64: 1, 32>}, {transform_indices = @transform_3, window_bounds = array<i64: 64, 32>}]} {
    %c0 = arith.constant 0 : index
    %c0_0 = arith.constant 0 : index
    %0 = vector.load %arg1[%c0, %c0_0] : memref<64x144xbf16, #tpu.memory_space<vmem>>, vector<64x144xbf16>
    %c0_1 = arith.constant 0 : index
    %c0_2 = arith.constant 0 : index
    %1 = vector.load %arg2[%c0_1, %c0_2] : memref<144x32xbf16, #tpu.memory_space<vmem>>, vector<144x32xbf16>
    %cst = arith.constant dense<0.000000e+00> : vector<64x32xf32>
    %2 = tpu.matmul %0, %1, %cst {dimension_numbers = #tpu.dot_dimension_numbers<[1], [0], [0], [1], [0, 0, 1, 1], [], []>} : vector<64x144xbf16>, vector<144x32xbf16>, vector<64x32xf32> -> vector<64x32xf32>
    %c0_3 = arith.constant 0 : index
    %c0_4 = arith.constant 0 : index
    %3 = vector.load %arg3[%c0_3, %c0_4] : memref<1x32xf32, #tpu.memory_space<vmem>>, vector<1x32xf32>
    %4 = vector.broadcast %3 : vector<1x32xf32> to vector<64x32xf32>
    %5 = arith.addf %2, %4 : vector<64x32xf32>
    %cst_5 = arith.constant 0.000000e+00 : f32
    %6 = vector.broadcast %cst_5 : f32 to vector<64x32xf32>
    %7 = arith.cmpf oge, %5, %6 : vector<64x32xf32>
    %cst_6 = arith.constant 2.000000e-01 : f32
    %8 = vector.broadcast %cst_6 : f32 to vector<64x32xf32>
    %9 = arith.mulf %8, %5 : vector<64x32xf32>
    %10 = arith.select %7, %5, %9 : vector<64x32xi1>, vector<64x32xf32>
    %11 = arith.truncf %10 : vector<64x32xf32> to vector<64x32xbf16>
    %c0_7 = arith.constant 0 : index
    %c0_8 = arith.constant 0 : index
    %12 = vector.load %arg4[%c0_7, %c0_8] : memref<64x32xbf16, #tpu.memory_space<vmem>>, vector<64x32xbf16>
    tpu.vector_store %arg4[%c0_7, %c0_8], %11 {strides = array<i32>} : memref<64x32xbf16, #tpu.memory_space<vmem>>, vector<64x32xbf16>,
    return
  }
  func.func @transform_0(%arg0: i32) -> (i32, i32) {
    %c0_i32 = arith.constant 0 : i32
    %c0_i32_0 = arith.constant 0 : i32
    return %arg0, %c0_i32 : i32, i32
  }
  func.func @transform_1(%arg0: i32) -> (i32, i32) {
    %c0_i32 = arith.constant 0 : i32
    %c0_i32_0 = arith.constant 0 : i32
    %c0_i32_1 = arith.constant 0 : i32
    return %c0_i32, %c0_i32_0 : i32, i32
  }
  func.func @transform_2(%arg0: i32) -> (i32, i32) {
    %c0_i32 = arith.constant 0 : i32
    %c0_i32_0 = arith.constant 0 : i32
    %c0_i32_1 = arith.constant 0 : i32
    return %c0_i32, %c0_i32_0 : i32, i32
  }
  func.func @transform_3(%arg0: i32) -> (i32, i32) {
    %c0_i32 = arith.constant 0 : i32
    %c0_i32_0 = arith.constant 0 : i32
    return %arg0, %c0_i32 : i32, i32
  }
}

module attributes {stable_mosaic.version = 11 : i64} {
  func.func @_conv_mse_kernel(%arg0: i32, %arg1: memref<64x288xbf16, #tpu.memory_space<vmem>>, %arg2: memref<288x1xbf16, #tpu.memory_space<vmem>>, %arg3: memref<1x1xf32, #tpu.memory_space<vmem>>, %arg4: memref<1x1xf32, #tpu.memory_space<vmem>>, %arg5: memref<64x1xf32, #tpu.memory_space<vmem>>) attributes {dimension_semantics = [#tpu.dimension_semantics<arbitrary>], iteration_bounds = array<i64: 1>, scalar_prefetch = 0 : i64, scratch_operands = 1 : i64, tpu.core_type = #tpu.core_type<tc>, window_params = [{transform_indices = @transform_0, window_bounds = array<i64: 64, 288>}, {pipeline_mode = #tpu.pipeline_mode<synchronous>, transform_indices = @transform_1, window_bounds = array<i64: 288, 1>}, {pipeline_mode = #tpu.pipeline_mode<synchronous>, transform_indices = @transform_2, window_bounds = array<i64: 1, 1>}, {pipeline_mode = #tpu.pipeline_mode<synchronous>, transform_indices = @transform_3, window_bounds = array<i64: 1, 1>}]} {
    %c0_i32 = arith.constant 0 : i32
    %0 = arith.cmpi eq, %arg0, %c0_i32 : i32
    %1 = arith.extui %0 : i1 to i32
    %c0_i32_0 = arith.constant 0 : i32
    %2 = arith.cmpi ne, %1, %c0_i32_0 : i32
    scf.if %2 {
      %cst_16 = arith.constant 0.000000e+00 : f32
      %30 = vector.broadcast %cst_16 : f32 to vector<64x1xf32>
      %c0_17 = arith.constant 0 : index
      %c0_18 = arith.constant 0 : index
      %31 = vector.load %arg5[%c0_17, %c0_18] : memref<64x1xf32, #tpu.memory_space<vmem>>, vector<64x1xf32>
      tpu.vector_store %arg5[%c0_17, %c0_18], %30 {strides = array<i32>} : memref<64x1xf32, #tpu.memory_space<vmem>>, vector<64x1xf32>,
      %cst_19 = arith.constant 0.000000e+00 : f32
      %32 = vector.broadcast %cst_19 : f32 to vector<1x1xf32>
      %c0_20 = arith.constant 0 : index
      %c0_21 = arith.constant 0 : index
      %33 = vector.load %arg4[%c0_20, %c0_21] : memref<1x1xf32, #tpu.memory_space<vmem>>, vector<1x1xf32>
      tpu.vector_store %arg4[%c0_20, %c0_21], %32 {strides = array<i32>} : memref<1x1xf32, #tpu.memory_space<vmem>>, vector<1x1xf32>,
    } else {
    }
    %c0 = arith.constant 0 : index
    %c0_1 = arith.constant 0 : index
    %3 = vector.load %arg1[%c0, %c0_1] : memref<64x288xbf16, #tpu.memory_space<vmem>>, vector<64x288xbf16>
    %c0_2 = arith.constant 0 : index
    %c0_3 = arith.constant 0 : index
    %4 = vector.load %arg2[%c0_2, %c0_3] : memref<288x1xbf16, #tpu.memory_space<vmem>>, vector<288x1xbf16>
    %cst = arith.constant dense<0.000000e+00> : vector<64x1xf32>
    %5 = tpu.matmul %3, %4, %cst {dimension_numbers = #tpu.dot_dimension_numbers<[1], [0], [0], [1], [0, 0, 1, 1], [], []>} : vector<64x288xbf16>, vector<288x1xbf16>, vector<64x1xf32> -> vector<64x1xf32>
    %c0_4 = arith.constant 0 : index
    %c0_5 = arith.constant 0 : index
    %6 = vector.load %arg3[%c0_4, %c0_5] : memref<1x1xf32, #tpu.memory_space<vmem>>, vector<1x1xf32>
    %7 = vector.broadcast %6 : vector<1x1xf32> to vector<64x1xf32>
    %8 = arith.addf %5, %7 : vector<64x1xf32>
    %c64_i32 = arith.constant 64 : i32
    %9 = arith.muli %arg0, %c64_i32 : i32
    %10 = tpu.iota {dimensions = array<i32: 0>} : vector<64x1xi32>
    %11 = vector.broadcast %9 : i32 to vector<64x1xi32>
    %12 = arith.addi %11, %10 : vector<64x1xi32>
    %c32_i32 = arith.constant 32 : i32
    %13 = vector.broadcast %c32_i32 : i32 to vector<64x1xi32>
    %14 = arith.cmpi slt, %12, %13 : vector<64x1xi32>
    %cst_6 = arith.constant 1.000000e+00 : f32
    %cst_7 = arith.constant 0.000000e+00 : f32
    %15 = vector.broadcast %cst_6 : f32 to vector<64x1xf32>
    %16 = vector.broadcast %cst_7 : f32 to vector<64x1xf32>
    %17 = arith.select %14, %15, %16 : vector<64x1xi1>, vector<64x1xf32>
    %c64_i32_8 = arith.constant 64 : i32
    %18 = vector.broadcast %c64_i32_8 : i32 to vector<64x1xi32>
    %19 = arith.cmpi slt, %12, %18 : vector<64x1xi32>
    %20 = arith.subf %8, %17 : vector<64x1xf32>
    %cst_9 = arith.constant 0.000000e+00 : f32
    %21 = vector.broadcast %cst_9 : f32 to vector<64x1xf32>
    %22 = arith.select %19, %20, %21 : vector<64x1xi1>, vector<64x1xf32>
    %c0_10 = arith.constant 0 : index
    %c0_11 = arith.constant 0 : index
    %23 = vector.load %arg5[%c0_10, %c0_11] : memref<64x1xf32, #tpu.memory_space<vmem>>, vector<64x1xf32>
    %24 = arith.mulf %22, %22 : vector<64x1xf32>
    %25 = arith.addf %23, %24 : vector<64x1xf32>
    %c0_12 = arith.constant 0 : index
    %c0_13 = arith.constant 0 : index
    %26 = vector.load %arg5[%c0_12, %c0_13] : memref<64x1xf32, #tpu.memory_space<vmem>>, vector<64x1xf32>
    tpu.vector_store %arg5[%c0_12, %c0_13], %25 {strides = array<i32>} : memref<64x1xf32, #tpu.memory_space<vmem>>, vector<64x1xf32>,
    %c0_i32_14 = arith.constant 0 : i32
    %27 = arith.cmpi eq, %arg0, %c0_i32_14 : i32
    %28 = arith.extui %27 : i1 to i32
    %c0_i32_15 = arith.constant 0 : i32
    %29 = arith.cmpi ne, %28, %c0_i32_15 : i32
    scf.if %29 {
      %c0_16 = arith.constant 0 : index
      %c0_17 = arith.constant 0 : index
      %30 = vector.load %arg5[%c0_16, %c0_17] : memref<64x1xf32, #tpu.memory_space<vmem>>, vector<64x1xf32>
      %31 = vector.shape_cast %30 : vector<64x1xf32> to vector<1x64x1xf32>
      %cst_18 = arith.constant dense<0.000000e+00> : vector<1xf32>
      %32 = vector.multi_reduction <add>, %31, %cst_18 [1, 2] : vector<1x64x1xf32> to vector<1xf32>
      %33 = vector.shape_cast %32 : vector<1xf32> to vector<1x1x1xf32>
      %34 = vector.extract %33[0, 0, 0] : f32 from vector<1x1x1xf32>
      %cst_19 = arith.constant 3.125000e-02 : f32
      %35 = arith.mulf %34, %cst_19 : f32
      %36 = vector.broadcast %35 : f32 to vector<1x1xf32>
      %c0_20 = arith.constant 0 : index
      %c0_21 = arith.constant 0 : index
      %37 = vector.load %arg4[%c0_20, %c0_21] : memref<1x1xf32, #tpu.memory_space<vmem>>, vector<1x1xf32>
      tpu.vector_store %arg4[%c0_20, %c0_21], %36 {strides = array<i32>} : memref<1x1xf32, #tpu.memory_space<vmem>>, vector<1x1xf32>,
    } else {
    }
    return
  }
  func.func @transform_0(%arg0: i32) -> (i32, i32) {
    %c0_i32 = arith.constant 0 : i32
    %c0_i32_0 = arith.constant 0 : i32
    return %arg0, %c0_i32 : i32, i32
  }
  func.func @transform_1(%arg0: i32) -> (i32, i32) {
    %c0_i32 = arith.constant 0 : i32
    %c0_i32_0 = arith.constant 0 : i32
    %c0_i32_1 = arith.constant 0 : i32
    return %c0_i32, %c0_i32_0 : i32, i32
  }
  func.func @transform_2(%arg0: i32) -> (i32, i32) {
    %c0_i32 = arith.constant 0 : i32
    %c0_i32_0 = arith.constant 0 : i32
    %c0_i32_1 = arith.constant 0 : i32
    return %c0_i32, %c0_i32_0 : i32, i32
  }
  func.func @transform_3(%arg0: i32) -> (i32, i32) {
    %c0_i32 = arith.constant 0 : i32
    %c0_i32_0 = arith.constant 0 : i32
    %c0_i32_1 = arith.constant 0 : i32
    return %c0_i32, %c0_i32_0 : i32, i32
  }
}

</mosaic_0001>

<bundles_post_ra>
// kernel: pangan_adv_discrim_spectral_loss.3
= control target key start
LH: loop header
LB: loop body
LE: loop exit
PB: predicated region body
PF: predicated region fallthrough
CT: control target
= control target key end

     0   :  { %vm203_vm0 = vcmask 1041408   ;;  %vm154_vm1 = vcmask 293888   ;;  %vm592_vm4 = vcmask 125952   ;;  %s1073_s1 = inlined_call_operand.vmem [shape: bf16[36,16], index: 1, kind: input, shape index: {}]   ;;  %s1074_s0 = inlined_call_operand.vmem [shape: bf16[256,36], index: 0, kind: input, shape index: {}]   ;;  %s1075_s2 = inlined_call_operand.vmem [shape: f32[1,16], index: 2, kind: input, shape index: {}]   ;;  %s1076_s3 = inlined_call_operand.vmem [shape: bf16[256,16], index: 3, kind: output, shape index: {}]  }
   0x1   :  { %v794_v0 = vld [vmem:[%s1073_s1 + $0x10] ss:$0 sps:$4 sm:$0x33]   ;;  %v795_v1 = vld [vmem:[%s1073_s1 + $0x8] sm:$0xff]   ;;  %v796_v3 = vld [vmem:[%s1073_s1] sm:$0xff]  }
   0x2   :  { %792 = vmatprep.subr.msk.bf16.mxu0 %vm203_vm0, %v794_v0  ;;  %793 = vmatprep.subr.msk.bf16.mxu1 %vm203_vm0, %v794_v0  ;;  %v205_v2 = vsel %vm203_vm0, %v794_v0, 0  ;;  %v797_v4 = vld [vmem:[%s1074_s0] sm:$0xff]   ;;  %v799_v6 = vld [vmem:[%s1074_s0 + $0x8] sm:$0xff]   ;;  %v801_v8 = vld [vmem:[%s1074_s0 + $0x10] sm:$0xff]  }
   0x3   :  { %749 = vmatpush3.bf16.msra.mxu0 %v205_v2  ;;  %789 = vmatpush3.bf16.msra.mxu1 %v205_v2  ;;  %v798_v5 = vld [vmem:[%s1074_s0 + $0x40] sm:$0xff]   ;;  %v800_v7 = vld [vmem:[%s1074_s0 + $0x48] sm:$0xff]   ;;  %v802_v9 = vld [vmem:[%s1074_s0 + $0x50] sm:$0xff]  }
   0x4   :  { %750 = vmatprep.subr.bf16.mxu0 %v795_v1  ;;  %787 = vmatprep.subr.bf16.mxu1 %v795_v1  ;;  %v803_v10 = vld [vmem:[%s1074_s0 + $0x18] sm:$0xff]   ;;  %v805_v12 = vld [vmem:[%s1074_s0 + $0x20] sm:$0xff]   ;;  %v807_v14 = vld [vmem:[%s1074_s0 + $0x28] sm:$0xff]  }
   0x5   :  { %754 = vmatprep.mubr.msk.bf16.mxu0 %vm154_vm1, %v797_v4  ;;  %770 = vmatprep.mubr.msk.bf16.mxu1 %vm154_vm1, %v798_v5  ;;  %v804_v11 = vld [vmem:[%s1074_s0 + $0x58] sm:$0xff]   ;;  %v806_v13 = vld [vmem:[%s1074_s0 + $0x60] sm:$0xff]   ;;  %v808_v15 = vld [vmem:[%s1074_s0 + $0x68] sm:$0xff]  }
   0x6   :  { %v809_v16 = vld [vmem:[%s1074_s0 + $0x30] sm:$0xff]   ;;  %v811_v18 = vld [vmem:[%s1074_s0 + $0x38] sm:$0xff]   ;;  %v909_v20 = vld [vmem:[%s1075_s2] ss:$0 sm:$0xff] }
   0x7   :  { %751 = vmatpush3.bf16.msra.mxu0 %v795_v1  ;;  %790 = vmatpush3.bf16.msra.mxu1 %v795_v1  ;;  %v810_v17 = vld [vmem:[%s1074_s0 + $0x70] sm:$0xff]   ;;  %v812_v19 = vld [vmem:[%s1074_s0 + $0x78] sm:$0xff]  }
   0x8   :  { %752 = vmatprep.subr.bf16.mxu0 %v796_v3  ;;  %788 = vmatprep.subr.bf16.mxu1 %v796_v3 }
   0xb   :  { %753 = vmatpush3.bf16.msra.mxu0 %v796_v3  ;;  %791 = vmatpush3.bf16.msra.mxu1 %v796_v3 }
   0xe   :  { %755 = vmatmul.mubr.msk.bf16.vlgmr.msra.gmra.mxu0 %vm154_vm1, %v799_v6  ;;  %771 = vmatmul.mubr.msk.bf16.vlgmr.msra.gmra.mxu1 %vm154_vm1, %v800_v7 }
   0xf   :  { %758 = vmatprep.mubr.msk.bf16.mxu0 %vm154_vm1, %v801_v8  ;;  %774 = vmatprep.mubr.msk.bf16.mxu1 %vm154_vm1, %v802_v9 }
  0x16   :  { %759 = vmatmul.mubr.msk.bf16.gmra.mxu0 %vm154_vm1, %v803_v10  ;;  %775 = vmatmul.mubr.msk.bf16.gmra.mxu1 %vm154_vm1, %v804_v11 }
  0x17   :  { %762 = vmatprep.mubr.msk.bf16.mxu0 %vm154_vm1, %v805_v12  ;;  %778 = vmatprep.mubr.msk.bf16.mxu1 %vm154_vm1, %v806_v13 }
  0x1e   :  { %763 = vmatmul.mubr.msk.bf16.gmra.mxu0 %vm154_vm1, %v807_v14  ;;  %779 = vmatmul.mubr.msk.bf16.gmra.mxu1 %vm154_vm1, %v808_v15 }
  0x1f   :  { %766 = vmatprep.mubr.msk.bf16.mxu0 %vm154_vm1, %v809_v16  ;;  %782 = vmatprep.mubr.msk.bf16.mxu1 %vm154_vm1, %v810_v17 }
  0x26   :  { %767 = vmatmul.mubr.msk.bf16.gmra.mxu0 %vm154_vm1, %v811_v18  ;;  %783 = vmatmul.mubr.msk.bf16.gmra.mxu1 %vm154_vm1, %v812_v19 }
  0xce   :  { %v756_v21 = vpop.f32.mrf.mxu0  ;;  %v772_v22 = vpop.f32.mrf.mxu1 }
  0xcf   :  { %v250_v23 = vadd.f32 %v756_v21, %v909_v20  ;;  %v314_v24 = vadd.f32 %v772_v22, %v909_v20 }
  0xd0   :  { %v241_v25 = vpop.f32.mrf.mxu0  ;;  %v305_v26 = vpop.f32.mrf.mxu1 }
  0xd1   :  { %vm370_vm2 = vcmp.ge.f32.partialorder %v250_v23, 0.0  ;;  %v402_v27 = vmul.f32 0.2, %v250_v23  ;;  %vm386_vm3 = vcmp.ge.f32.partialorder %v314_v24, 0.0  ;;  %v418_v28 = vmul.f32 0.2, %v314_v24 }
  0xd2   :  { %v242_v29 = vadd.f32 %v909_v20, %v241_v25  ;;  %v306_v30 = vadd.f32 %v909_v20, %v305_v26  ;;  %v757_v31 = vpop.f32.mrf.mxu0  ;;  %v773_v32 = vpop.f32.mrf.mxu1 }
  0xd3   :  { %v434_v33 = vsel %vm370_vm2, %v250_v23, %v402_v27  ;;  %v450_v34 = vsel %vm386_vm3, %v314_v24, %v418_v28  ;;  %v253_v35 = vadd.f32 %v757_v31, %v909_v20  ;;  %v317_v36 = vadd.f32 %v773_v32, %v909_v20 }
  0xd4   :  { %v699_v37 = vpack.c.bf16 %v434_v33, %v434_v33  ;;  %v715_v38 = vpack.c.bf16 %v450_v34, %v450_v34  ;;  %vm368_vm5 = vcmp.ge.f32.partialorder %v242_v29, 0.0  ;;  %v400_v39 = vmul.f32 0.2, %v242_v29  ;;  %v244_v40 = vpop.f32.mrf.mxu0  ;;  %v308_v41 = vpop.f32.mrf.mxu1 }
  0xd5   :  { %vm384_vm6 = vcmp.ge.f32.partialorder %v306_v30, 0.0  ;;  %v416_v42 = vmul.f32 0.2, %v306_v30  ;;  %vm371_vm7 = vcmp.ge.f32.partialorder %v253_v35, 0.0  ;;  %v403_v43 = vmul.f32 0.2, %v253_v35 }
  0xd6   :  { %595 = vst.msk [vmem:[%s1076_s3 + $0x8] sm:$0xf] %vm592_vm4, %v699_v37  ;;  %611 = vst.msk [vmem:[%s1076_s3 + $0x48] sm:$0xf] %vm592_vm4, %v715_v38  ;;  %v432_v44 = vsel %vm368_vm5, %v242_v29, %v400_v39  ;;  %vm387_vm8 = vcmp.ge.f32.partialorder %v317_v36, 0.0  ;;  %v245_v46 = vadd.f32 %v909_v20, %v244_v40  ;;  %v760_v47 = vpop.f32.mrf.mxu0  ;;  %v776_v48 = vpop.f32.mrf.mxu1  ;;  %v309_v52 = vadd.f32 %v909_v20, %v308_v41 }
  0xd7   :  { %v419_v45 = vmul.f32 0.2, %v317_v36  ;;  %v697_v49 = vpack.c.bf16 %v432_v44, %v432_v44  ;;  %v448_v50 = vsel %vm384_vm6, %v306_v30, %v416_v42  ;;  %v435_v51 = vsel %vm371_vm7, %v253_v35, %v403_v43 }
  0xd8   :  { %v713_v53 = vpack.c.bf16 %v448_v50, %v448_v50  ;;  %v700_v54 = vpack.c.bf16 %v435_v51, %v435_v51  ;;  %vm369_vm9 = vcmp.ge.f32.partialorder %v245_v46, 0.0  ;;  %v257_v56 = vpop.f32.mrf.mxu0  ;;  %v321_v57 = vpop.f32.mrf.mxu1  ;;  %v401_v59 = vmul.f32 0.2, %v245_v46 }
  0xd9   :  { %v451_v55 = vsel %vm387_vm8, %v317_v36, %v419_v45  ;;  %593 = vst.msk [vmem:[%s1076_s3] sm:$0xf] %vm592_vm4, %v697_v49  ;;  %vm385_vm10 = vcmp.ge.f32.partialorder %v309_v52, 0.0  ;;  %v417_v60 = vmul.f32 0.2, %v309_v52  ;;  %v266_v61 = vadd.f32 %v760_v47, %v909_v20 }
  0xda   :  { %v716_v58 = vpack.c.bf16 %v451_v55, %v451_v55  ;;  %609 = vst.msk [vmem:[%s1076_s3 + $0x40] sm:$0xf] %vm592_vm4, %v713_v53  ;;  %596 = vst.msk [vmem:[%s1076_s3 + $0xc] sm:$0xf] %vm592_vm4, %v700_v54  ;;  %v330_v62 = vadd.f32 %v776_v48, %v909_v20  ;;  %v258_v63 = vadd.f32 %v909_v20, %v257_v56  ;;  %v761_v1 = vpop.f32.mrf.mxu0  ;;  %v777_v2 = vpop.f32.mrf.mxu1 }
  0xdb   :  { %v322_v0 = vadd.f32 %v909_v20, %v321_v57  ;;  %v433_v3 = vsel %vm369_vm9, %v245_v46, %v401_v59  ;;  %v449_v4 = vsel %vm385_vm10, %v309_v52, %v417_v60  ;;  %v269_v5 = vadd.f32 %v761_v1, %v909_v20 }
  0xdc   :  { %612 = vst.msk [vmem:[%s1076_s3 + $0x4c] sm:$0xf] %vm592_vm4, %v716_v58  ;;  %v333_v6 = vadd.f32 %v777_v2, %v909_v20  ;;  %v698_v7 = vpack.c.bf16 %v433_v3, %v433_v3  ;;  %v714_v8 = vpack.c.bf16 %v449_v4, %v449_v4  ;;  %vm374_vm11 = vcmp.ge.f32.partialorder %v266_v61, 0.0  ;;  %v260_v10 = vpop.f32.mrf.mxu0  ;;  %v324_v11 = vpop.f32.mrf.mxu1 }
  0xdd   :  { %v406_v9 = vmul.f32 0.2, %v266_v61  ;;  %vm390_vm12 = vcmp.ge.f32.partialorder %v330_v62, 0.0  ;;  %v422_v12 = vmul.f32 0.2, %v330_v62  ;;  %vm372_vm13 = vcmp.ge.f32.partialorder %v258_v63, 0.0 }
  0xde   :  { %v404_v13 = vmul.f32 0.2, %v258_v63  ;;  %594 = vst.msk [vmem:[%s1076_s3 + $0x4] sm:$0xf] %vm592_vm4, %v698_v7  ;;  %610 = vst.msk [vmem:[%s1076_s3 + $0x44] sm:$0xf] %vm592_vm4, %v714_v8  ;;  %v764_v16 = vpop.f32.mrf.mxu0  ;;  %v780_v17 = vpop.f32.mrf.mxu1  ;;  %v261_v31 = vadd.f32 %v909_v20, %v260_v10  ;;  %v325_v33 = vadd.f32 %v909_v20, %v324_v11 }
  0xdf   :  { %v438_v14 = vsel %vm374_vm11, %v266_v61, %v406_v9  ;;  %vm388_vm14 = vcmp.ge.f32.partialorder %v322_v0, 0.0  ;;  %v420_v15 = vmul.f32 0.2, %v322_v0  ;;  %vm375_vm15 = vcmp.ge.f32.partialorder %v269_v5, 0.0 }
  0xe0   :  { %v703_v18 = vpack.c.bf16 %v438_v14, %v438_v14  ;;  %v454_v19 = vsel %vm390_vm12, %v330_v62, %v422_v12  ;;  %v436_v21 = vsel %vm372_vm13, %v258_v63, %v404_v13  ;;  %v407_v22 = vmul.f32 0.2, %v269_v5  ;;  %v273_v26 = vpop.f32.mrf.mxu0  ;;  %v337_v27 = vpop.f32.mrf.mxu1 }
  0xe1   :  { %v719_v23 = vpack.c.bf16 %v454_v19, %v454_v19  ;;  %v701_v24 = vpack.c.bf16 %v436_v21, %v436_v21  ;;  %v452_v25 = vsel %vm388_vm14, %v322_v0, %v420_v15  ;;  %vm391_vm0 = vcmp.ge.f32.partialorder %v333_v6, 0.0 }
  0xe2   :  { %599 = vst.msk [vmem:[%s1076_s3 + $0x18] sm:$0xf] %vm592_vm4, %v703_v18  ;;  %v717_v28 = vpack.c.bf16 %v452_v25, %v452_v25  ;;  %v439_v29 = vsel %vm375_vm15, %v269_v5, %v407_v22  ;;  %v423_v30 = vmul.f32 0.2, %v333_v6  ;;  %v282_v34 = vadd.f32 %v764_v16, %v909_v20  ;;  %v765_v36 = vpop.f32.mrf.mxu0  ;;  %v781_v37 = vpop.f32.mrf.mxu1 }
  0xe3   :  { %615 = vst.msk [vmem:[%s1076_s3 + $0x58] sm:$0xf] %vm592_vm4, %v719_v23  ;;  %597 = vst.msk [vmem:[%s1076_s3 + $0x10] sm:$0xf] %vm592_vm4, %v701_v24  ;;  %v704_v32 = vpack.c.bf16 %v439_v29, %v439_v29  ;;  %v346_v35 = vadd.f32 %v780_v17, %v909_v20  ;;  %vm373_vm1 = vcmp.ge.f32.partialorder %v261_v31, 0.0  ;;  %v274_v40 = vadd.f32 %v909_v20, %v273_v26 }
  0xe4   :  { %613 = vst.msk [vmem:[%s1076_s3 + $0x50] sm:$0xf] %vm592_vm4, %v717_v28  ;;  %v455_v38 = vsel %vm391_vm0, %v333_v6, %v423_v30  ;;  %v405_v39 = vmul.f32 0.2, %v261_v31  ;;  %vm389_vm2 = vcmp.ge.f32.partialorder %v325_v33, 0.0  ;;  %vm378_vm3 = vcmp.ge.f32.partialorder %v282_v34, 0.0  ;;  %v276_v43 = vpop.f32.mrf.mxu0  ;;  %v340_v44 = vpop.f32.mrf.mxu1 }
  0xe5   :  { %600 = vst.msk [vmem:[%s1076_s3 + $0x1c] sm:$0xf] %vm592_vm4, %v704_v32  ;;  %v720_v41 = vpack.c.bf16 %v455_v38, %v455_v38  ;;  %v421_v42 = vmul.f32 0.2, %v325_v33  ;;  %v410_v46 = vmul.f32 0.2, %v282_v34  ;;  %v338_v56 = vadd.f32 %v909_v20, %v337_v27 }
  0xe6   :  { %v437_v45 = vsel %vm373_vm1, %v261_v31, %v405_v39  ;;  %vm394_vm5 = vcmp.ge.f32.partialorder %v346_v35, 0.0  ;;  %v426_v47 = vmul.f32 0.2, %v346_v35  ;;  %vm376_vm6 = vcmp.ge.f32.partialorder %v274_v40, 0.0  ;;  %v768_v51 = vpop.f32.mrf.mxu0  ;;  %v784_v52 = vpop.f32.mrf.mxu1 }
  0xe7   :  { %616 = vst.msk [vmem:[%s1076_s3 + $0x5c] sm:$0xf] %vm592_vm4, %v720_v41  ;;  %v702_v48 = vpack.c.bf16 %v437_v45, %v437_v45  ;;  %v453_v49 = vsel %vm389_vm2, %v325_v33, %v421_v42  ;;  %v408_v50 = vmul.f32 0.2, %v274_v40  ;;  %v442_v54 = vsel %vm378_vm3, %v282_v34, %v410_v46 }
  0xe8   :  { %v718_v53 = vpack.c.bf16 %v453_v49, %v453_v49  ;;  %v458_v55 = vsel %vm394_vm5, %v346_v35, %v426_v47  ;;  %v707_v57 = vpack.c.bf16 %v442_v54, %v442_v54  ;;  %v285_v60 = vadd.f32 %v765_v36, %v909_v20  ;;  %v289_v61 = vpop.f32.mrf.mxu0  ;;  %v353_v1 = vpop.f32.mrf.mxu1 }
  0xe9   :  { %598 = vst.msk [vmem:[%s1076_s3 + $0x14] sm:$0xf] %vm592_vm4, %v702_v48  ;;  %v723_v58 = vpack.c.bf16 %v458_v55, %v458_v55  ;;  %v440_v59 = vsel %vm376_vm6, %v274_v40, %v408_v50  ;;  %vm392_vm7 = vcmp.ge.f32.partialorder %v338_v56, 0.0  ;;  %v424_v63 = vmul.f32 0.2, %v338_v56 }
  0xea   :  { %614 = vst.msk [vmem:[%s1076_s3 + $0x54] sm:$0xf] %vm592_vm4, %v718_v53  ;;  %v705_v62 = vpack.c.bf16 %v440_v59, %v440_v59  ;;  %v349_v0 = vadd.f32 %v781_v37, %v909_v20  ;;  %603 = vst.msk [vmem:[%s1076_s3 + $0x28] sm:$0xf] %vm592_vm4, %v707_v57  ;;  %vm379_vm8 = vcmp.ge.f32.partialorder %v285_v60, 0.0  ;;  %v277_v3 = vadd.f32 %v909_v20, %v276_v43  ;;  %v769_v11 = vpop.f32.mrf.mxu0  ;;  %v785_v15 = vpop.f32.mrf.mxu1 }
  0xeb   :  { %619 = vst.msk [vmem:[%s1076_s3 + $0x68] sm:$0xf] %vm592_vm4, %v723_v58  ;;  %v411_v2 = vmul.f32 0.2, %v285_v60  ;;  %v341_v4 = vadd.f32 %v909_v20, %v340_v44  ;;  %v456_v5 = vsel %vm392_vm7, %v338_v56, %v424_v63  ;;  %v298_v7 = vadd.f32 %v768_v51, %v909_v20 }
  0xec   :  { %601 = vst.msk [vmem:[%s1076_s3 + $0x20] sm:$0xf] %vm592_vm4, %v705_v62  ;;  %vm395_vm9 = vcmp.ge.f32.partialorder %v349_v0, 0.0  ;;  %v427_v6 = vmul.f32 0.2, %v349_v0  ;;  %v721_v8 = vpack.c.bf16 %v456_v5, %v456_v5  ;;  %vm377_vm10 = vcmp.ge.f32.partialorder %v277_v3, 0.0  ;;  %v292_v28 = vpop.f32.mrf.mxu0  ;;  %v356_v31 = vpop.f32.mrf.mxu1 }
  0xed   :  { %v443_v9 = vsel %vm379_vm8, %v285_v60, %v411_v2  ;;  %v409_v10 = vmul.f32 0.2, %v277_v3  ;;  %vm393_vm11 = vcmp.ge.f32.partialorder %v341_v4, 0.0  ;;  %v425_v14 = vmul.f32 0.2, %v341_v4 }
  0xee   :  { %v708_v12 = vpack.c.bf16 %v443_v9, %v443_v9  ;;  %v459_v13 = vsel %vm395_vm9, %v349_v0, %v427_v6  ;;  %617 = vst.msk [vmem:[%s1076_s3 + $0x60] sm:$0xf] %vm592_vm4, %v721_v8  ;;  %vm382_vm12 = vcmp.ge.f32.partialorder %v298_v7, 0.0  ;;  %v414_v18 = vmul.f32 0.2, %v298_v7 }
  0xef   :  { %v724_v16 = vpack.c.bf16 %v459_v13, %v459_v13  ;;  %v441_v17 = vsel %vm377_vm10, %v277_v3, %v409_v10  ;;  %v457_v21 = vsel %vm393_vm11, %v341_v4, %v425_v14  ;;  %v362_v22 = vadd.f32 %v784_v52, %v909_v20 }
  0xf0   :  { %604 = vst.msk [vmem:[%s1076_s3 + $0x2c] sm:$0xf] %vm592_vm4, %v708_v12  ;;  %v706_v19 = vpack.c.bf16 %v441_v17, %v441_v17  ;;  %v290_v23 = vadd.f32 %v909_v20, %v289_v61  ;;  %v722_v24 = vpack.c.bf16 %v457_v21, %v457_v21  ;;  %v446_v25 = vsel %vm382_vm12, %v298_v7, %v414_v18 }
  0xf1   :  { %620 = vst.msk [vmem:[%s1076_s3 + $0x6c] sm:$0xf] %vm592_vm4, %v724_v16  ;;  %v354_v26 = vadd.f32 %v909_v20, %v353_v1  ;;  %v301_v27 = vadd.f32 %v769_v11, %v909_v20  ;;  %v711_v29 = vpack.c.bf16 %v446_v25, %v446_v25  ;;  %vm398_vm13 = vcmp.ge.f32.partialorder %v362_v22, 0.0 }
  0xf2   :  { %602 = vst.msk [vmem:[%s1076_s3 + $0x24] sm:$0xf] %vm592_vm4, %v706_v19  ;;  %v430_v30 = vmul.f32 0.2, %v362_v22  ;;  %vm380_vm14 = vcmp.ge.f32.partialorder %v290_v23, 0.0  ;;  %v365_v36 = vadd.f32 %v785_v15, %v909_v20  ;;  %v293_v37 = vadd.f32 %v909_v20, %v292_v28 }
  0xf3   :  { %618 = vst.msk [vmem:[%s1076_s3 + $0x64] sm:$0xf] %vm592_vm4, %v722_v24  ;;  %v412_v32 = vmul.f32 0.2, %v290_v23  ;;  %vm396_vm15 = vcmp.ge.f32.partialorder %v354_v26, 0.0  ;;  %vm383_vm0 = vcmp.ge.f32.partialorder %v301_v27, 0.0  ;;  %v357_v41 = vadd.f32 %v909_v20, %v356_v31 }
  0xf4   :  { %v428_v33 = vmul.f32 0.2, %v354_v26  ;;  %607 = vst.msk [vmem:[%s1076_s3 + $0x38] sm:$0xf] %vm592_vm4, %v711_v29  ;;  %v462_v34 = vsel %vm398_vm13, %v362_v22, %v430_v30  ;;  %v415_v35 = vmul.f32 0.2, %v301_v27 }
  0xf5   :  { %v727_v38 = vpack.c.bf16 %v462_v34, %v462_v34  ;;  %v444_v39 = vsel %vm380_vm14, %v290_v23, %v412_v32  ;;  %vm399_vm1 = vcmp.ge.f32.partialorder %v365_v36, 0.0  ;;  %v431_v46 = vmul.f32 0.2, %v365_v36 }
  0xf6   :  { %v460_v40 = vsel %vm396_vm15, %v354_v26, %v428_v33  ;;  %v709_v42 = vpack.c.bf16 %v444_v39, %v444_v39  ;;  %v447_v44 = vsel %vm383_vm0, %v301_v27, %v415_v35  ;;  %vm381_vm2 = vcmp.ge.f32.partialorder %v293_v37, 0.0 }
  0xf7   :  { %v725_v43 = vpack.c.bf16 %v460_v40, %v460_v40  ;;  %623 = vst.msk [vmem:[%s1076_s3 + $0x78] sm:$0xf] %vm592_vm4, %v727_v38  ;;  %v712_v45 = vpack.c.bf16 %v447_v44, %v447_v44  ;;  %v413_v47 = vmul.f32 0.2, %v293_v37  ;;  %vm397_vm3 = vcmp.ge.f32.partialorder %v357_v41, 0.0 }
  0xf8   :  { %605 = vst.msk [vmem:[%s1076_s3 + $0x30] sm:$0xf] %vm592_vm4, %v709_v42  ;;  %v429_v20 = vmul.f32 0.2, %v357_v41  ;;  %v463_v48 = vsel %vm399_vm1, %v365_v36, %v431_v46 }
  0xf9   :  { %621 = vst.msk [vmem:[%s1076_s3 + $0x70] sm:$0xf] %vm592_vm4, %v725_v43  ;;  %608 = vst.msk [vmem:[%s1076_s3 + $0x3c] sm:$0xf] %vm592_vm4, %v712_v45  ;;  %v445_v49 = vsel %vm381_vm2, %v293_v37, %v413_v47  ;;  %v728_v50 = vpack.c.bf16 %v463_v48, %v463_v48 }
  0xfa   :  { %v710_v51 = vpack.c.bf16 %v445_v49, %v445_v49  ;;  %v461_v52 = vsel %vm397_vm3, %v357_v41, %v429_v20 }
  0xfb   :  { %v726_v53 = vpack.c.bf16 %v461_v52, %v461_v52  ;;  %624 = vst.msk [vmem:[%s1076_s3 + $0x7c] sm:$0xf] %vm592_vm4, %v728_v50 }
  0xfc   :  { %606 = vst.msk [vmem:[%s1076_s3 + $0x34] sm:$0xf] %vm592_vm4, %v710_v51 }
  0xfd   :  { %622 = vst.msk [vmem:[%s1076_s3 + $0x74] sm:$0xf] %vm592_vm4, %v726_v53 }

// kernel: pangan_adv_discrim_spectral_loss.4
= control target key start
LH: loop header
LB: loop body
LE: loop exit
PB: predicated region body
PF: predicated region fallthrough
CT: control target
= control target key end

     0   :  { %v363_v0 = vmov 0   ;;  %vm138_vm0 = vcmask 130048   ;;  %vm272_vm3 = vcmask 257024   ;;  %s474_s1 = inlined_call_operand.vmem [shape: bf16[144,32], index: 1, kind: input, shape index: {}]   ;;  %s475_s0 = inlined_call_operand.vmem [shape: bf16[64,144], index: 0, kind: input, shape index: {}]   ;;  %s476_s2 = inlined_call_operand.vmem [shape: f32[1,32], index: 2, kind: input, shape index: {}]   ;;  %s477_s3 = inlined_call_operand.vmem [shape: bf16[64,32], index: 3, kind: output, shape index: {}]  }
   0x1   :  { %151 = vmatprep.subr.bf16.mxu0 %v363_v0  ;;  %323 = vmatprep.subr.bf16.mxu1 %v363_v0  ;;  %v342_v1 = vld [vmem:[%s474_s1 + $0x38] sm:$0xff]   ;;  %v343_v2 = vld [vmem:[%s474_s1 + $0x30] sm:$0xff]   ;;  %v344_v3 = vld [vmem:[%s474_s1 + $0x28] sm:$0xff]  }
   0x2   :  { %152 = vmatpush1.bf16.msra.mxu0 %v342_v1  ;;  %332 = vmatpush1.bf16.msra.mxu1 %v342_v1  ;;  %v345_v4 = vld [vmem:[%s474_s1 + $0x20] sm:$0xff]   ;;  %v346_v7 = vld [vmem:[%s474_s1 + $0x18] sm:$0xff]   ;;  %v347_v8 = vld [vmem:[%s474_s1 + $0x10] sm:$0xff]  }
   0x3   :  { %153 = vmatprep.subr.bf16.mxu0 %v363_v0  ;;  %324 = vmatprep.subr.bf16.mxu1 %v363_v0  ;;  %v353_v5 = vld [vmem:[%s475_s0 + $0x4] ss:$8 sps:$4 sm:$0xff]   ;;  %v351_v12 = vld [vmem:[%s475_s0] ss:$8 sps:$4 sm:$0xff]   ;;  %v357_v14 = vld [vmem:[%s475_s0 + $0x14] ss:$8 sps:$4 sm:$0xff]  }
   0x4   :  { %v356_v6 = vld [vmem:[%s475_s0 + $0x24] ss:$8 sps:$4 sm:$0xff]   ;;  %303 = vmatprep.mubr.msk.bf16.mxu0 %vm138_vm0, %v353_v5  ;;  %v354_v13 = vld [vmem:[%s475_s0 + $0x20] ss:$8 sps:$4 sm:$0xff]   ;;  %v359_v15 = vld [vmem:[%s475_s0 + $0x34] ss:$8 sps:$4 sm:$0xff]  }
   0x5   :  { %305 = vmatprep.mubr.msk.bf16.mxu1 %vm138_vm0, %v356_v6  ;;  %v348_v9 = vld [vmem:[%s474_s1 + $0x8] sm:$0xff]   ;;  %v349_v10 = vld [vmem:[%s474_s1] sm:$0xff]   ;;  %v361_v16 = vld [vmem:[%s475_s0 + $0x10] ss:$8 sps:$4 sm:$0xff]  }
   0x6   :  { %154 = vmatpush1.bf16.msra.mxu0 %v343_v2  ;;  %333 = vmatpush1.bf16.msra.mxu1 %v343_v2  ;;  %v350_v11 = vld [vmem:[%s474_s1 + $0x40] sm:$0xff]   ;;  %v362_v17 = vld [vmem:[%s475_s0 + $0x30] ss:$8 sps:$4 sm:$0xff]  }
   0x7   :  { %155 = vmatprep.subr.bf16.mxu0 %v363_v0  ;;  %325 = vmatprep.subr.bf16.mxu1 %v363_v0  ;;  %v285_v18 = vld [vmem:[%s476_s2] ss:$0 sm:$0xff] }
   0xa   :  { %156 = vmatpush1.bf16.msra.mxu0 %v344_v3  ;;  %334 = vmatpush1.bf16.msra.mxu1 %v344_v3 }
   0xb   :  { %157 = vmatprep.subr.bf16.mxu0 %v363_v0  ;;  %326 = vmatprep.subr.bf16.mxu1 %v363_v0 }
   0xe   :  { %158 = vmatpush1.bf16.msra.mxu0 %v345_v4  ;;  %335 = vmatpush1.bf16.msra.mxu1 %v345_v4 }
   0xf   :  { %159 = vmatprep.subr.bf16.mxu0 %v363_v0  ;;  %327 = vmatprep.subr.bf16.mxu1 %v363_v0 }
  0x12   :  { %160 = vmatpush1.bf16.msra.mxu0 %v346_v7  ;;  %336 = vmatpush1.bf16.msra.mxu1 %v346_v7 }
  0x13   :  { %161 = vmatprep.subr.bf16.mxu0 %v363_v0  ;;  %328 = vmatprep.subr.bf16.mxu1 %v363_v0 }
  0x16   :  { %162 = vmatpush1.bf16.msra.mxu0 %v347_v8  ;;  %337 = vmatpush1.bf16.msra.mxu1 %v347_v8 }
  0x17   :  { %163 = vmatprep.subr.bf16.mxu0 %v363_v0  ;;  %329 = vmatprep.subr.bf16.mxu1 %v363_v0 }
  0x1a   :  { %164 = vmatpush1.bf16.msra.mxu0 %v348_v9  ;;  %338 = vmatpush1.bf16.msra.mxu1 %v348_v9 }
  0x1b   :  { %165 = vmatprep.subr.bf16.mxu0 %v363_v0  ;;  %330 = vmatprep.subr.bf16.mxu1 %v363_v0 }
  0x1e   :  { %166 = vmatpush1.bf16.msra.mxu0 %v349_v10  ;;  %339 = vmatpush1.bf16.msra.mxu1 %v349_v10 }
  0x1f   :  { %181 = vmatprep.subr.bf16.mxu0 %v363_v0  ;;  %331 = vmatprep.subr.bf16.mxu1 %v363_v0 }
  0x22   :  { %182 = vmatpush2.bf16.msra.mxu0 %v350_v11  ;;  %340 = vmatpush2.bf16.msra.mxu1 %v350_v11 }
  0x25   :  { %184 = vmatmul.mubr.bf16.vlgmr.msra.gmra.mxu0 %v351_v12  ;;  %200 = vmatmul.mubr.bf16.vlgmr.msra.gmra.mxu1 %v354_v13 }
  0x26   :  { %304 = vmatprep.mubr.msk.bf16.mxu0 %vm138_vm0, %v357_v14  ;;  %306 = vmatprep.mubr.msk.bf16.mxu1 %vm138_vm0, %v359_v15 }
  0x2d   :  { %192 = vmatmul.mubr.bf16.gmra.mxu0 %v361_v16  ;;  %208 = vmatmul.mubr.bf16.gmra.mxu1 %v362_v17 }
  0xe5   :  { %v185_v19 = vpop.f32.mrf.mxu0  ;;  %v201_v20 = vpop.f32.mrf.mxu1 }
  0xe6   :  { %v186_v21 = vadd.f32 %v285_v18, %v185_v19  ;;  %v202_v22 = vadd.f32 %v285_v18, %v201_v20 }
  0xe7   :  { %v187_v23 = vpop.f32.mrf.mxu0  ;;  %v203_v24 = vpop.f32.mrf.mxu1 }
  0xe8   :  { %vm216_vm1 = vcmp.ge.f32.partialorder %v186_v21, 0.0  ;;  %v224_v25 = vmul.f32 0.2, %v186_v21  ;;  %vm220_vm2 = vcmp.ge.f32.partialorder %v202_v22, 0.0  ;;  %v228_v26 = vmul.f32 0.2, %v202_v22 }
  0xe9   :  { %v188_v27 = vpop.f32.mrf.mxu0  ;;  %v204_v28 = vpop.f32.mrf.mxu1 }
  0xea   :  { %v232_v29 = vsel %vm216_vm1, %v186_v21, %v224_v25  ;;  %v236_v30 = vsel %vm220_vm2, %v202_v22, %v228_v26  ;;  %v189_v31 = vadd.f32 %v285_v18, %v188_v27  ;;  %v205_v32 = vadd.f32 %v285_v18, %v204_v28 }
  0xeb   :  { %v315_v33 = vpack.c.bf16 %v232_v29, %v232_v29  ;;  %v319_v34 = vpack.c.bf16 %v236_v30, %v236_v30  ;;  %v190_v35 = vpop.f32.mrf.mxu0  ;;  %v206_v36 = vpop.f32.mrf.mxu1 }
  0xec   :  { %vm217_vm4 = vcmp.ge.f32.partialorder %v189_v31, 0.0  ;;  %v225_v37 = vmul.f32 0.2, %v189_v31  ;;  %vm221_vm5 = vcmp.ge.f32.partialorder %v205_v32, 0.0  ;;  %v229_v38 = vmul.f32 0.2, %v205_v32 }
  0xed   :  { %273 = vst.msk [vmem:[%s477_s3] sm:$0xf] %vm272_vm3, %v315_v33  ;;  %277 = vst.msk [vmem:[%s477_s3 + $0x10] sm:$0xf] %vm272_vm3, %v319_v34  ;;  %v193_v39 = vpop.f32.mrf.mxu0  ;;  %v209_v40 = vpop.f32.mrf.mxu1 }
  0xee   :  { %v233_v41 = vsel %vm217_vm4, %v189_v31, %v225_v37  ;;  %v237_v42 = vsel %vm221_vm5, %v205_v32, %v229_v38  ;;  %v194_v43 = vadd.f32 %v285_v18, %v193_v39  ;;  %v210_v44 = vadd.f32 %v285_v18, %v209_v40 }
  0xef   :  { %v316_v45 = vpack.c.bf16 %v233_v41, %v233_v41  ;;  %v320_v46 = vpack.c.bf16 %v237_v42, %v237_v42  ;;  %v195_v47 = vpop.f32.mrf.mxu0  ;;  %v211_v48 = vpop.f32.mrf.mxu1 }
  0xf0   :  { %vm218_vm6 = vcmp.ge.f32.partialorder %v194_v43, 0.0  ;;  %v226_v49 = vmul.f32 0.2, %v194_v43  ;;  %vm222_vm7 = vcmp.ge.f32.partialorder %v210_v44, 0.0  ;;  %v230_v50 = vmul.f32 0.2, %v210_v44 }
  0xf1   :  { %274 = vst.msk [vmem:[%s477_s3 + $0x4] sm:$0xf] %vm272_vm3, %v316_v45  ;;  %278 = vst.msk [vmem:[%s477_s3 + $0x14] sm:$0xf] %vm272_vm3, %v320_v46  ;;  %v196_v51 = vpop.f32.mrf.mxu0  ;;  %v212_v52 = vpop.f32.mrf.mxu1 }
  0xf2   :  { %v234_v53 = vsel %vm218_vm6, %v194_v43, %v226_v49  ;;  %v238_v54 = vsel %vm222_vm7, %v210_v44, %v230_v50  ;;  %v197_v55 = vadd.f32 %v285_v18, %v196_v51  ;;  %v213_v56 = vadd.f32 %v285_v18, %v212_v52 }
  0xf3   :  { %v317_v57 = vpack.c.bf16 %v234_v53, %v234_v53  ;;  %v321_v58 = vpack.c.bf16 %v238_v54, %v238_v54  ;;  %v198_v59 = vpop.f32.mrf.mxu0  ;;  %v214_v60 = vpop.f32.mrf.mxu1 }
  0xf4   :  { %vm219_vm8 = vcmp.ge.f32.partialorder %v197_v55, 0.0  ;;  %v227_v61 = vmul.f32 0.2, %v197_v55  ;;  %vm223_vm9 = vcmp.ge.f32.partialorder %v213_v56, 0.0  ;;  %v231_v62 = vmul.f32 0.2, %v213_v56 }
  0xf5   :  { %275 = vst.msk [vmem:[%s477_s3 + $0x8] sm:$0xf] %vm272_vm3, %v317_v57  ;;  %279 = vst.msk [vmem:[%s477_s3 + $0x18] sm:$0xf] %vm272_vm3, %v321_v58 }
  0xf6   :  { %v235_v63 = vsel %vm219_vm8, %v197_v55, %v227_v61  ;;  %v239_v0 = vsel %vm223_vm9, %v213_v56, %v231_v62 }
  0xf7   :  { %v318_v1 = vpack.c.bf16 %v235_v63, %v235_v63  ;;  %v322_v2 = vpack.c.bf16 %v239_v0, %v239_v0 }
  0xf9   :  { %276 = vst.msk [vmem:[%s477_s3 + $0xc] sm:$0xf] %vm272_vm3, %v318_v1  ;;  %280 = vst.msk [vmem:[%s477_s3 + $0x1c] sm:$0xf] %vm272_vm3, %v322_v2 }

// kernel: pangan_adv_discrim_spectral_loss.5
= control target key start
LH: loop header
LB: loop body
LE: loop exit
PB: predicated region body
PF: predicated region fallthrough
CT: control target
= control target key end

     0   :  { %s888_s0 = inlined_call_operand.vmem [shape: bf16[64,288], index: 0, kind: input, shape index: {}]   ;;  %s889_s1 = inlined_call_operand.vmem [shape: bf16[288,1], index: 1, kind: input, shape index: {}]   ;;  %s890_s2 = inlined_call_operand.<no memory space> [shape: f32[1,1], index: 2, kind: input, shape index: {}]   ;;  %s891_s3 = inlined_call_operand.hbm [shape: f32[1,1], index: 3, kind: output, shape index: {}]  }
   0x1   :  { %v8_v0 = vstv %s890_s2 }
   0x2   :  { %9 = vst [vmem:[#allocation3] sm:$0x1] %v8_v0 }
   0x3   :  { %v665_v1 = vld [vmem:[%s889_s1 + $0x78] sm:$0xff]   ;;  %v667_v3 = vld [vmem:[%s889_s1 + $0x70] sm:$0xff]   ;;  %v669_v5 = vld [vmem:[%s889_s1 + $0x68] sm:$0xff]  }
   0x4   :  { %v666_v2 = vld [vmem:[%s889_s1 + $0x38] sm:$0xff]   ;;  %587 = vmatprep.subr.bf16.mxu0 %v665_v1  ;;  %645 = vmatprep.subr.bf16.mxu1 %v665_v1  ;;  %v668_v4 = vld [vmem:[%s889_s1 + $0x30] sm:$0xff]   ;;  %v670_v6 = vld [vmem:[%s889_s1 + $0x28] sm:$0xff]  }
   0x5   :  { %588 = vmatpush3.bf16.msra.mxu0 %v666_v2  ;;  %653 = vmatpush3.bf16.msra.mxu1 %v666_v2  ;;  %v671_v7 = vld [vmem:[%s889_s1 + $0x60] sm:$0xff]   ;;  %v673_v9 = vld [vmem:[%s889_s1 + $0x58] sm:$0xff]   ;;  %v675_v11 = vld [vmem:[%s889_s1 + $0x50] sm:$0xff]  }
   0x6   :  { %589 = vmatprep.subr.bf16.mxu0 %v667_v3  ;;  %646 = vmatprep.subr.bf16.mxu1 %v667_v3  ;;  %v672_v8 = vld [vmem:[%s889_s1 + $0x20] sm:$0xff]   ;;  %v674_v10 = vld [vmem:[%s889_s1 + $0x18] sm:$0xff]   ;;  %v676_v14 = vld [vmem:[%s889_s1 + $0x10] sm:$0xff]  }
   0x7   :  { %v683_v12 = vld [vmem:[%s888_s0 + $0x4] ss:$12 sps:$4 sm:$0xff]   ;;  %v686_v13 = vld [vmem:[%s888_s0 + $0x4c] ss:$12 sps:$4 sm:$0xff]  }
   0x8   :  { %v677_v15 = vld [vmem:[%s889_s1 + $0x48] sm:$0xff]   ;;  %305 = vmatprep.mubr.bf16.mxu0 %v683_v12  ;;  %329 = vmatprep.mubr.bf16.mxu1 %v686_v13  ;;  %v679_v17 = vld [vmem:[%s889_s1 + $0x40] sm:$0xff]  }
   0x9   :  { %590 = vmatpush3.bf16.msra.mxu0 %v668_v4  ;;  %654 = vmatpush3.bf16.msra.mxu1 %v668_v4  ;;  %v678_v16 = vld [vmem:[%s889_s1 + $0x8] sm:$0xff]   ;;  %v680_v18 = vld [vmem:[%s889_s1] sm:$0xff]  }
   0xa   :  { %591 = vmatprep.subr.bf16.mxu0 %v669_v5  ;;  %647 = vmatprep.subr.bf16.mxu1 %v669_v5 }
   0xd   :  { %592 = vmatpush3.bf16.msra.mxu0 %v670_v6  ;;  %655 = vmatpush3.bf16.msra.mxu1 %v670_v6 }
   0xe   :  { %593 = vmatprep.subr.bf16.mxu0 %v671_v7  ;;  %648 = vmatprep.subr.bf16.mxu1 %v671_v7 }
  0x11   :  { %594 = vmatpush3.bf16.msra.mxu0 %v672_v8  ;;  %656 = vmatpush3.bf16.msra.mxu1 %v672_v8 }
  0x12   :  { %595 = vmatprep.subr.bf16.mxu0 %v673_v9  ;;  %649 = vmatprep.subr.bf16.mxu1 %v673_v9 }
  0x15   :  { %596 = vmatpush3.bf16.msra.mxu0 %v674_v10  ;;  %657 = vmatpush3.bf16.msra.mxu1 %v674_v10 }
  0x16   :  { %597 = vmatprep.subr.bf16.mxu0 %v675_v11  ;;  %650 = vmatprep.subr.bf16.mxu1 %v675_v11 }
  0x19   :  { %598 = vmatpush3.bf16.msra.mxu0 %v676_v14  ;;  %658 = vmatpush3.bf16.msra.mxu1 %v676_v14 }
  0x1a   :  { %599 = vmatprep.subr.bf16.mxu0 %v677_v15  ;;  %651 = vmatprep.subr.bf16.mxu1 %v677_v15 }
  0x1d   :  { %600 = vmatpush3.bf16.msra.mxu0 %v678_v16  ;;  %659 = vmatpush3.bf16.msra.mxu1 %v678_v16 }
  0x1e   :  { %10 = vsyncpa [#allocation5], 0  ;;  %601 = vmatprep.subr.bf16.mxu0 %v679_v17  ;;  %652 = vmatprep.subr.bf16.mxu1 %v679_v17  ;;  %v687_v19 = vld [vmem:[%s889_s1 + $0x88] sm:$0xff]   ;;  %v688_v23 = vld [vmem:[%s889_s1 + $0x80] sm:$0xff]   ;;  %vm260_vm0 = vcmask 261120   ;;  %vm22_vm1 = vcmask 7168  }
  0x1f   :  { %v681_v20 = vld [vmem:[%s888_s0] ss:$12 sps:$4 sm:$0xff]   ;;  %v684_v21 = vld [vmem:[%s888_s0 + $0x48] ss:$12 sps:$4 sm:$0xff]   ;;  %v692_v25 = vld [vmem:[%s888_s0 + $0x18] ss:$12 sps:$4 sm:$0xff]  }
  0x20   :  { %v689_v22 = vld [vmem:[%s888_s0 + $0x1c] ss:$12 sps:$4 sm:$0xff]   ;;  %v693_v26 = vld [vmem:[%s888_s0 + $0x20] ss:$12 sps:$4 sm:$0xff]   ;;  %v696_v28 = vld [vmem:[%s888_s0 + $0x38] ss:$12 sps:$4 sm:$0xff]  }
  0x21   :  { %602 = vmatpush3.bf16.msra.mxu0 %v680_v18  ;;  %660 = vmatpush3.bf16.msra.mxu1 %v680_v18  ;;  %v691_v24 = vld [vmem:[%s888_s0 + $0x8] ss:$12 sps:$4 sm:$0xff]   ;;  %v697_v29 = vld [vmem:[%s888_s0 + $0x30] ss:$12 sps:$4 sm:$0xff]   ;;  %v721_v31 = vmov 0.0   ;;  %vm31_vm2 = vcmask 0  }
  0x22   :  { %633 = vmatprep.subr.bf16.mxu1 %v687_v19  ;;  %v694_v27 = vld [vmem:[%s888_s0 + $0x34] ss:$12 sps:$4 sm:$0xff]   ;;  %v698_v30 = vld [vmem:[%s888_s0 + $0x50] ss:$12 sps:$4 sm:$0xff]   ;;  %25 = vst.msk [vmem:[#allocation2 + $0x10] sm:$0xff] %vm22_vm1, %v721_v31  ;;  %23 = vst.msk [vmem:[#allocation2] sm:$0xff] %vm22_vm1, %v721_v31 }
  0x23   :  { %24 = vst.msk [vmem:[#allocation2 + $0x8] sm:$0xff] %vm22_vm1, %v721_v31  ;;  %26 = vst.msk [vmem:[#allocation2 + $0x18] sm:$0xff] %vm22_vm1, %v721_v31  ;;  %v856_v41 = vld [vmem:[#allocation3] ss:$0 sm:$0xff]  ;;  %s722_s0 = smov [#allocation4]  }
  0x24   :  { %306 = vmatmul.mubr.bf16.vlgmr.msra.gmra.mxu0 %v681_v20  ;;  %330 = vmatmul.mubr.bf16.vlgmr.msra.gmra.mxu1 %v684_v21  ;;  %27 = vst.msk [vmem:[#allocation2 + $0x20] sm:$0xff] %vm22_vm1, %v721_v31  ;;  %28 = vst.msk [vmem:[#allocation2 + $0x28] sm:$0xff] %vm22_vm1, %v721_v31  ;;  %s540_s17 = sshll.u32 %s722_s0, 4  ;;  %s541_s17 = int_to_ptr.vmem [resolvable:$true] %s540_s17 }
  0x25   :  { %634 = vmatpush3.bf16.msra.mxu1 %v687_v19  ;;  %313 = vmatprep.mubr.bf16.mxu0 %v689_v22  ;;  %29 = vst.msk [vmem:[#allocation2 + $0x30] sm:$0xff] %vm22_vm1, %v721_v31  ;;  %30 = vst.msk [vmem:[#allocation2 + $0x38] sm:$0xff] %vm22_vm1, %v721_v31  ;;  %s699_s20 = scalar_lea.vmem %s541_s17, 16  ;;  %s703_s21 = scalar_lea.vmem %s541_s17, 32 }
  0x26   :  { %635 = vmatprep.subr.bf16.mxu1 %v688_v23  ;;  %637 = vmatprep.mubr.msk.bf16.mxu1 %vm260_vm0, %v691_v24  ;;  %32 = vst.msk [vmem:[#allocation4] sm:$0x1] %vm31_vm2, %v721_v31  ;;  %p700_p0 = scmp.ne.s32.totalorder %s541_s17, %s699_s20  ;;  %p704_p1 = scmp.lt.s32.totalorder %s541_s17, %s541_s17 }
  0x27   :  { %p705_p2 = scmp.lt.s32.totalorder %s703_s21, %s699_s20 }
  0x29   :  { %636 = vmatpush3.bf16.msra.mxu1 %v688_v23  ;;  %v462_v56 = vld [vmem:[#allocation2] sm:$0xff]  ;;  %v464_v7 = vld [vmem:[#allocation2 + $0x10] sm:$0xff]  ;;  %p706_p3 = por %p705_p2, %p704_p1 }
  0x2a   :  { %v463_v8 = vld [vmem:[#allocation2 + $0x8] sm:$0xff] }
  0x2b   :  { %p707_p4 = pnand %p706_p3, %p700_p0 }
  0x2c   :  { %314 = vmatmul.mubr.bf16.gmra.mxu0 %v692_v25  ;;  %638 = vmatmul.mubr.msk.bf16.vlgmr.msra.gmra.mxu1 %vm260_vm0, %v693_v26  ;;  %v468_v15 = vld [vmem:[#allocation2 + $0x30] sm:$0xff]  ;;  %v465_v25 = vld [vmem:[#allocation2 + $0x18] sm:$0xff] }
  0x2d   :  { %321 = vmatprep.mubr.bf16.mxu0 %v694_v27  ;;  %641 = vmatprep.mubr.msk.bf16.mxu1 %vm260_vm0, %v696_v28 }
  0x34   :  { %322 = vmatmul.mubr.bf16.gmra.mxu0 %v697_v29  ;;  %642 = vmatmul.mubr.msk.bf16.gmra.mxu1 %vm260_vm0, %v698_v30 }
  0xe4   :  { %v603_v32 = vpop.f32.mrf.mxu0  ;;  %v621_v33 = vpop.f32.mrf.mxu1 }
  0xe6   :  { %v604_v34 = vpop.f32.mrf.mxu0  ;;  %v622_v35 = vpop.f32.mrf.mxu1 }
  0xe7   :  { %v605_v38 = vadd.f32 %v604_v34, %v603_v32  ;;  %v623_v50 = vadd.f32 %v622_v35, %v621_v33  ;;  %v469_v32 = vld [vmem:[#allocation2 + $0x38] sm:$0xff]  ;;  %v466_v34 = vld [vmem:[#allocation2 + $0x20] sm:$0xff] }
  0xe8   :  { %v606_v36 = vpop.f32.mrf.mxu0  ;;  %v624_v37 = vpop.f32.mrf.mxu1 }
  0xe9   :  { %v308_v45 = vadd.f32 %v605_v38, %v856_v41  ;;  %v332_v1 = vadd.f32 %v623_v50, %v856_v41 }
  0xea   :  { %v607_v39 = vpop.f32.mrf.mxu0  ;;  %v625_v40 = vpop.f32.mrf.mxu1 }
  0xeb   :  { %v608_v44 = vadd.f32 %v607_v39, %v606_v36  ;;  %v626_v63 = vadd.f32 %v625_v40, %v624_v37 }
  0xec   :  { %v609_v42 = vpop.f32.mrf.mxu0  ;;  %v639_v43 = vpop.f32.mrf.mxu1 }
  0xed   :  { %v311_v55 = vadd.f32 %v608_v44, %v856_v41  ;;  %v335_v19 = vadd.f32 %v626_v63, %v856_v41  ;;  %v467_v44 = vld [vmem:[#allocation2 + $0x28] sm:$0xff] }
  0xee   :  { %v610_v46 = vpop.f32.mrf.mxu0  ;;  %v372_v47 = vpop.f32.mrf.mxu1 }
  0xef   :  { %v611_v48 = vadd.f32 %v610_v46, %v609_v42  ;;  %v373_v49 = vadd.f32 %v372_v47, %v308_v45 }
  0xf0   :  { %v612_v51 = vpop.f32.mrf.mxu0  ;;  %v640_v52 = vpop.f32.mrf.mxu1 }
  0xf1   :  { %v316_v53 = vadd.f32 %v611_v48, %v856_v41  ;;  %v583_v54 = vadd.f32 -1.0, %v373_v49 }
  0xf2   :  { %v613_v57 = vpop.f32.mrf.mxu0  ;;  %v375_v58 = vpop.f32.mrf.mxu1 }
  0xf3   :  { %v381_v59 = vadd.f32 %v639_v43, %v316_v53  ;;  %v470_v60 = vmul.f32 %v583_v54, %v583_v54  ;;  %v614_v61 = vadd.f32 %v613_v57, %v612_v51  ;;  %v376_v62 = vadd.f32 %v375_v58, %v311_v55 }
  0xf4   :  { %v615_v0 = vpop.f32.mrf.mxu0  ;;  %v643_v2 = vpop.f32.mrf.mxu1 }
  0xf5   :  { %v585_v3 = vadd.f32 -1.0, %v381_v59  ;;  %v478_v4 = vadd.f32 %v470_v60, %v462_v56  ;;  %v319_v5 = vadd.f32 %v614_v61, %v856_v41  ;;  %v584_v6 = vadd.f32 -1.0, %v376_v62 }
  0xf6   :  { %v397_v9 = vadd.f32 %v643_v2, %v332_v1  ;;  %v616_v10 = vpop.f32.mrf.mxu0  ;;  %v388_v11 = vpop.f32.mrf.mxu1 }
  0xf7   :  { %v472_v12 = vmul.f32 %v585_v3, %v585_v3  ;;  %487 = vst.msk [vmem:[#allocation2] sm:$0xff] %vm22_vm1, %v478_v4  ;;  %v384_v13 = vadd.f32 %v640_v52, %v319_v5  ;;  %v471_v14 = vmul.f32 %v584_v6, %v584_v6  ;;  %v617_v16 = vadd.f32 %v616_v10, %v615_v0 }
  0xf8   :  { %v476_v17 = vmul.f32 %v397_v9, %v397_v9  ;;  %v618_v18 = vpop.f32.mrf.mxu0  ;;  %v644_v20 = vpop.f32.mrf.mxu1 }
  0xf9   :  { %v480_v21 = vadd.f32 %v472_v12, %v464_v7  ;;  %v586_v22 = vadd.f32 -1.0, %v384_v13  ;;  %v479_v23 = vadd.f32 %v471_v14, %v463_v8  ;;  %v324_v24 = vadd.f32 %v617_v16, %v856_v41 }
  0xfa   :  { %v484_v26 = vadd.f32 %v476_v17, %v468_v15  ;;  %v400_v27 = vadd.f32 %v644_v20, %v335_v19  ;;  %v619_v28 = vpop.f32.mrf.mxu0  ;;  %v391_v40 = vpop.f32.mrf.mxu1 }
  0xfb   :  { %489 = vst.msk [vmem:[#allocation2 + $0x10] sm:$0xff] %vm22_vm1, %v480_v21  ;;  %v473_v29 = vmul.f32 %v586_v22, %v586_v22  ;;  %488 = vst.msk [vmem:[#allocation2 + $0x8] sm:$0xff] %vm22_vm1, %v479_v23  ;;  %v389_v30 = vadd.f32 %v388_v11, %v324_v24  ;;  %v620_v33 = vadd.f32 %v619_v28, %v618_v18 }
  0xfc   :  { %493 = vst.msk [vmem:[#allocation2 + $0x30] sm:$0xff] %vm22_vm1, %v484_v26  ;;  %v477_v35 = vmul.f32 %v400_v27, %v400_v27 }
  0xfd   :  { %v481_v36 = vadd.f32 %v473_v29, %v465_v25  ;;  %v474_v37 = vmul.f32 %v389_v30, %v389_v30  ;;  %v327_v38 = vadd.f32 %v620_v33, %v856_v41 }
  0xfe   :  { %v485_v39 = vadd.f32 %v477_v35, %v469_v32  ;;  %v498_v45 = vld [vmem:[#allocation2] sm:$0xff] }
  0xff   :  { %490 = vst.msk [vmem:[#allocation2 + $0x18] sm:$0xff] %vm22_vm1, %v481_v36  ;;  %v482_v42 = vadd.f32 %v474_v37, %v466_v34  ;;  %v392_v43 = vadd.f32 %v391_v40, %v327_v38  ;;  %v506_v50 = vsel %vm22_vm1, %v498_v45, 0.0 }
 0x100   :  { %494 = vst.msk [vmem:[#allocation2 + $0x38] sm:$0xff] %vm22_vm1, %v485_v39 }
 0x101   :  { %491 = vst.msk [vmem:[#allocation2 + $0x20] sm:$0xff] %vm22_vm1, %v482_v42  ;;  %v475_v46 = vmul.f32 %v392_v43, %v392_v43 }
 0x102   :  { %v499_v47 = vld [vmem:[#allocation2 + $0x8] sm:$0xff]  ;;  %v500_v48 = vld [vmem:[#allocation2 + $0x10] sm:$0xff] }
 0x103   :  { %v483_v49 = vadd.f32 %v475_v46, %v467_v44  ;;  %v507_v41 = vsel %vm22_vm1, %v499_v47, 0.0  ;;  %v509_v52 = vsel %vm22_vm1, %v500_v48, 0.0  ;;  %v504_v60 = vld [vmem:[#allocation2 + $0x30] sm:$0xff] }
 0x104   :  { %v508_v51 = vadd.f32 %v507_v41, %v506_v50  ;;  %v517_v1 = vsel %vm22_vm1, %v504_v60, 0.0 }
 0x105   :  { %492 = vst.msk [vmem:[#allocation2 + $0x28] sm:$0xff] %vm22_vm1, %v483_v49 }
 0x106   :  { %v501_v53 = vld [vmem:[#allocation2 + $0x18] sm:$0xff]  ;;  %v510_v54 = vadd.f32 %v509_v52, %v508_v51 }
 0x107   :  { %v511_v55 = vsel %vm22_vm1, %v501_v53, 0.0  ;;  %v505_v63 = vld [vmem:[#allocation2 + $0x38] sm:$0xff] }
 0x108   :  { %v502_v56 = vld [vmem:[#allocation2 + $0x20] sm:$0xff]  ;;  %v512_v57 = vadd.f32 %v511_v55, %v510_v54  ;;  %v519_v3 = vsel %vm22_vm1, %v505_v63, 0.0 }
 0x109   :  { %v513_v58 = vsel %vm22_vm1, %v502_v56, 0.0 }
 0x10a   :  { %v514_v61 = vadd.f32 %v513_v58, %v512_v57 }
 0x10c   :  { %v503_v59 = vld [vmem:[#allocation2 + $0x28] sm:$0xff] }
 0x10d   :  { %v515_v62 = vsel %vm22_vm1, %v503_v59, 0.0 }
 0x10e   :  { %v516_v0 = vadd.f32 %v515_v62, %v514_v61 }
 0x110   :  { %v518_v2 = vadd.f32 %v517_v1, %v516_v0 }
 0x112   :  { %v520_v4 = vadd.f32 %v519_v3, %v518_v2 }
 0x114   :  { %521 = vadd.xlane.f32.xlu0 %v520_v4 }
 0x19d   :  { %v522_v5 = vpop.xlane.xlu0 %521 }
 0x19e   :  { %v523_v6 = vrot.slane %v522_v5, 4 }
 0x1a0   :  { %v524_v7 = vadd.f32 %v523_v6, %v522_v5 }
 0x1a2   :  { %v525_v8 = vrot.slane %v524_v7, 2 }
 0x1a4   :  { %v526_v9 = vadd.f32 %v525_v8, %v524_v7 }
 0x1a6   :  { %v527_v10 = vrot.slane %v526_v9, 1 }
 0x1a8   :  { %v528_v11 = vadd.f32 %v527_v10, %v526_v9 }
 0x1aa   :  { %661 = vpush %v528_v11 }
 0x1db   :  { %s662_s18 = spop %661 }
 0x1dc   :  { %s530_s19 = smul.f32 0.03125, %s662_s18 }
 0x1de   :  { %v531_v12 = vstv %s530_s19 }
 0x1df   :  { %533 = vst.msk [vmem:[#allocation4] sm:$0x1] %vm31_vm2, %v531_v12 }
 0x1e0   :  { %710 = shalt.err (!%p707_p4)
}
 0x1e1   :  { %543 = dma.vmem_to_hbm [thread:$0]  %s541_s17, 16, %s891_s3, [#allocation5]  }
 0x1e2   :  { %719 = dma.done.wait [#allocation5], 16  }
 0x1e3   :  { %720 = vsyncadd [#allocation5], 4294967280 }
 0x1e4   :  { %547 = vsyncpa [#allocation5], 1 }

</bundles_post_ra>
